<compile_context>
chip_gen: v5e
topology: v5e:2x2
jax: 0.10.0
libtpu: 0.0.40
codegen_flags: <defaults>
</compile_context>

<pallas_src>
import jax
import jax.numpy as jnp
from jax.experimental import pallas as pl
from jax.experimental.pallas import tpu as pltpu

CHANNELS = 128
NUM_LAYERS = 3              # as in MLP(layers=3)
IN_FEATURES = 28 * 28       # 784
K_PAD = 896                 # 784 padded up to 7 * 128 lanes


def mlp_kernel(*refs):
    """refs = (x_ref, w0, b0, w1, b1, ..., wN, bN, out_ref).

    One grid step processes a (TB, K_PAD) batch tile.  Weights/biases use
    constant index_maps so they stay VMEM-resident across grid steps while the
    x / out tiles are pipelined (double-buffered) by the BlockSpec machinery.
    Matmul operands are bf16 (MXU-native); accumulation + bias/ReLU epilogue
    stay f32 on the VPU.
    """
    x_ref = refs[0]
    o_ref = refs[-1]
    param_refs = refs[1:-1]
    n_linear = len(param_refs) // 2

    h = x_ref[...]                                      # bf16 tile
    for li in range(n_linear):
        w = param_refs[2 * li][...]                     # bf16
        b = param_refs[2 * li + 1][...]                 # f32
        h = jnp.dot(h, w, preferred_element_type=jnp.float32) + b
        if li != n_linear - 1:                          # no ReLU after last Linear
            h = jnp.maximum(h, 0.0)
            h = h.astype(jnp.bfloat16)                  # next matmul operand
    o_ref[...] = h.astype(o_ref.dtype)


def _round_up(x, m):
    return ((x + m - 1) // m) * m


def init_params(key, channels=CHANNELS, layers=NUM_LAYERS):
    """Deterministic init matching nn.Linear default (U(-1/sqrt(fan_in), +))."""
    dims = [IN_FEATURES] + [channels] * (layers + 1)
    params = []
    for i in range(len(dims) - 1):
        fan_in, fan_out = dims[i], dims[i + 1]
        key, kw, kb = jax.random.split(key, 3)
        bound = 1.0 / (fan_in ** 0.5)
        w = jax.random.uniform(kw, (fan_in, fan_out), jnp.float32, -bound, bound)
        b = jax.random.uniform(kb, (1, fan_out), jnp.float32, -bound, bound)
        params.append((w, b))
    return params


def prepare_params(params):
    """Pad W0 rows 784 -> 896 (zeros), cast weights to bf16, keep biases f32."""
    flat = []
    for i, (w, b) in enumerate(params):
        if i == 0:
            w = jnp.pad(w, ((0, K_PAD - w.shape[0]), (0, 0)))
        flat.append(w.astype(jnp.bfloat16))
        flat.append(b.reshape(1, -1).astype(jnp.float32))
    return tuple(flat)


@jax.jit
def mlp_forward(x, flat_params):
    # PyTorch semantics: if channel dim == 3, mean over channels (keepdim),
    # then flatten to (B, -1).  Static shape check, so fine under jit.
    if x.shape[1] == 3:
        x = jnp.mean(x, axis=1, keepdims=True)
    B = x.shape[0]
    xf = x.reshape(B, -1).astype(jnp.float32)
    assert xf.shape[1] == IN_FEATURES, xf.shape

    # Zero-pad feature dim 784 -> 896 (clean lane tiling), cast to bf16
    # (halves HBM bytes of the dominant x stream; accumulation stays f32).
    xf = jnp.pad(xf, ((0, 0), (0, K_PAD - IN_FEATURES))).astype(jnp.bfloat16)

    out_dim = flat_params[-2].shape[1]

    # Batch tile: 512 rows amortizes per-grid-step overhead and fills MXU rows
    # (multiple of 256 for v6e/v7x, 128 for v5e).  For small batches round up
    # to a multiple of 16 (bf16 sublane packing) and pad with zero rows.
    if B >= 512:
        tb = 512
    else:
        tb = max(16, _round_up(B, 16))
    b_pad = _round_up(B, tb)
    if b_pad != B:
        xf = jnp.pad(xf, ((0, b_pad - B), (0, 0)))
    n_tiles = b_pad // tb

    x_spec = pl.BlockSpec((tb, K_PAD), lambda i: (i, 0))
    out_spec = pl.BlockSpec((tb, out_dim), lambda i: (i, 0))
    # Full-extent, grid-invariant specs: params are DMA'd once and stay resident.
    param_specs = [pl.BlockSpec(p.shape, lambda i: (0, 0)) for p in flat_params]

    flops = sum(2 * b_pad * w.shape[0] * w.shape[1] for w in flat_params[0::2])
    bytes_accessed = (
        xf.size * xf.dtype.itemsize
        + sum(int(p.size) * p.dtype.itemsize for p in flat_params)
        + b_pad * out_dim * 4
    )

    out = pl.pallas_call(
        mlp_kernel,
        out_shape=jax.ShapeDtypeStruct((b_pad, out_dim), jnp.float32),
        grid=(n_tiles,),
        in_specs=[x_spec] + param_specs,
        out_specs=out_spec,
        compiler_params=pltpu.CompilerParams(
            dimension_semantics=("parallel",)),
        cost_estimate=pl.CostEstimate(
            flops=flops, transcendentals=0, bytes_accessed=bytes_accessed),
    )(xf, *flat_params)

    return out[:B]


def mlp_reference(x, params):
    if x.shape[1] == 3:
        x = jnp.mean(x, axis=1, keepdims=True)
    h = x.reshape(x.shape[0], -1).astype(jnp.float32)
    n = len(params)
    for i, (w, b) in enumerate(params):
        h = h @ w + b
        if i != n - 1:
            h = jnp.maximum(h, 0.0)
    return h


if __name__ == "__main__":
    key = jax.random.PRNGKey(0)
    key, kx, kp = jax.random.split(key, 3)

    # Small batch, 3-channel 28x28 input (exercises the mean-over-channels path).
    x = jax.random.uniform(kx, (2, 3, 28, 28), jnp.float32)
    params = init_params(kp)
    flat_params = prepare_params(params)

    out = mlp_forward(x, flat_params)
    out = jax.block_until_ready(out)

    ref = mlp_reference(x, params)
    assert out.shape == (2, CHANNELS), out.shape
    max_err = float(jnp.max(jnp.abs(out - ref)))
    assert jnp.allclose(out, ref, rtol=1e-2, atol=1e-2), max_err
    print("KERNEL_OK")
</pallas_src>

<mosaic_0001>
module attributes {stable_mosaic.version = 11 : i64} {
  func.func @mlp_kernel(%arg0: i32, %arg1: memref<16x896xbf16, #tpu.memory_space<vmem>>, %arg2: memref<896x128xbf16, #tpu.memory_space<vmem>>, %arg3: memref<1x128xf32, #tpu.memory_space<vmem>>, %arg4: memref<128x128xbf16, #tpu.memory_space<vmem>>, %arg5: memref<1x128xf32, #tpu.memory_space<vmem>>, %arg6: memref<128x128xbf16, #tpu.memory_space<vmem>>, %arg7: memref<1x128xf32, #tpu.memory_space<vmem>>, %arg8: memref<128x128xbf16, #tpu.memory_space<vmem>>, %arg9: memref<1x128xf32, #tpu.memory_space<vmem>>, %arg10: memref<16x128xf32, #tpu.memory_space<vmem>>) attributes {dimension_semantics = [#tpu.dimension_semantics<parallel>], iteration_bounds = array<i64: 1>, scalar_prefetch = 0 : i64, scratch_operands = 0 : i64, tpu.core_type = #tpu.core_type<tc>, window_params = [{transform_indices = @transform_0, window_bounds = array<i64: 16, 896>}, {pipeline_mode = #tpu.pipeline_mode<synchronous>, transform_indices = @transform_1, window_bounds = array<i64: 896, 128>}, {pipeline_mode = #tpu.pipeline_mode<synchronous>, transform_indices = @transform_2, window_bounds = array<i64: 1, 128>}, {pipeline_mode = #tpu.pipeline_mode<synchronous>, transform_indices = @transform_3, window_bounds = array<i64: 128, 128>}, {pipeline_mode = #tpu.pipeline_mode<synchronous>, transform_indices = @transform_4, window_bounds = array<i64: 1, 128>}, {pipeline_mode = #tpu.pipeline_mode<synchronous>, transform_indices = @transform_5, window_bounds = array<i64: 128, 128>}, {pipeline_mode = #tpu.pipeline_mode<synchronous>, transform_indices = @transform_6, window_bounds = array<i64: 1, 128>}, {pipeline_mode = #tpu.pipeline_mode<synchronous>, transform_indices = @transform_7, window_bounds = array<i64: 128, 128>}, {pipeline_mode = #tpu.pipeline_mode<synchronous>, transform_indices = @transform_8, window_bounds = array<i64: 1, 128>}, {transform_indices = @transform_9, window_bounds = array<i64: 16, 128>}]} {
    %c0 = arith.constant 0 : index
    %c0_0 = arith.constant 0 : index
    %0 = vector.load %arg1[%c0, %c0_0] : memref<16x896xbf16, #tpu.memory_space<vmem>>, vector<16x896xbf16>
    %c0_1 = arith.constant 0 : index
    %c0_2 = arith.constant 0 : index
    %1 = vector.load %arg2[%c0_1, %c0_2] : memref<896x128xbf16, #tpu.memory_space<vmem>>, vector<896x128xbf16>
    %c0_3 = arith.constant 0 : index
    %c0_4 = arith.constant 0 : index
    %2 = vector.load %arg3[%c0_3, %c0_4] : memref<1x128xf32, #tpu.memory_space<vmem>>, vector<1x128xf32>
    %cst = arith.constant dense<0.000000e+00> : vector<16x128xf32>
    %3 = tpu.matmul %0, %1, %cst {dimension_numbers = #tpu.dot_dimension_numbers<[1], [0], [0], [1], [0, 0, 1, 1], [], []>} : vector<16x896xbf16>, vector<896x128xbf16>, vector<16x128xf32> -> vector<16x128xf32>
    %4 = vector.broadcast %2 : vector<1x128xf32> to vector<16x128xf32>
    %5 = arith.addf %3, %4 : vector<16x128xf32>
    %cst_5 = arith.constant 0.000000e+00 : f32
    %6 = vector.broadcast %cst_5 : f32 to vector<16x128xf32>
    %7 = arith.maximumf %5, %6 : vector<16x128xf32>
    %8 = arith.truncf %7 : vector<16x128xf32> to vector<16x128xbf16>
    %c0_6 = arith.constant 0 : index
    %c0_7 = arith.constant 0 : index
    %9 = vector.load %arg4[%c0_6, %c0_7] : memref<128x128xbf16, #tpu.memory_space<vmem>>, vector<128x128xbf16>
    %c0_8 = arith.constant 0 : index
    %c0_9 = arith.constant 0 : index
    %10 = vector.load %arg5[%c0_8, %c0_9] : memref<1x128xf32, #tpu.memory_space<vmem>>, vector<1x128xf32>
    %cst_10 = arith.constant dense<0.000000e+00> : vector<16x128xf32>
    %11 = tpu.matmul %8, %9, %cst_10 {dimension_numbers = #tpu.dot_dimension_numbers<[1], [0], [0], [1], [0, 0, 1, 1], [], []>} : vector<16x128xbf16>, vector<128x128xbf16>, vector<16x128xf32> -> vector<16x128xf32>
    %12 = vector.broadcast %10 : vector<1x128xf32> to vector<16x128xf32>
    %13 = arith.addf %11, %12 : vector<16x128xf32>
    %cst_11 = arith.constant 0.000000e+00 : f32
    %14 = vector.broadcast %cst_11 : f32 to vector<16x128xf32>
    %15 = arith.maximumf %13, %14 : vector<16x128xf32>
    %16 = arith.truncf %15 : vector<16x128xf32> to vector<16x128xbf16>
    %c0_12 = arith.constant 0 : index
    %c0_13 = arith.constant 0 : index
    %17 = vector.load %arg6[%c0_12, %c0_13] : memref<128x128xbf16, #tpu.memory_space<vmem>>, vector<128x128xbf16>
    %c0_14 = arith.constant 0 : index
    %c0_15 = arith.constant 0 : index
    %18 = vector.load %arg7[%c0_14, %c0_15] : memref<1x128xf32, #tpu.memory_space<vmem>>, vector<1x128xf32>
    %cst_16 = arith.constant dense<0.000000e+00> : vector<16x128xf32>
    %19 = tpu.matmul %16, %17, %cst_16 {dimension_numbers = #tpu.dot_dimension_numbers<[1], [0], [0], [1], [0, 0, 1, 1], [], []>} : vector<16x128xbf16>, vector<128x128xbf16>, vector<16x128xf32> -> vector<16x128xf32>
    %20 = vector.broadcast %18 : vector<1x128xf32> to vector<16x128xf32>
    %21 = arith.addf %19, %20 : vector<16x128xf32>
    %cst_17 = arith.constant 0.000000e+00 : f32
    %22 = vector.broadcast %cst_17 : f32 to vector<16x128xf32>
    %23 = arith.maximumf %21, %22 : vector<16x128xf32>
    %24 = arith.truncf %23 : vector<16x128xf32> to vector<16x128xbf16>
    %c0_18 = arith.constant 0 : index
    %c0_19 = arith.constant 0 : index
    %25 = vector.load %arg8[%c0_18, %c0_19] : memref<128x128xbf16, #tpu.memory_space<vmem>>, vector<128x128xbf16>
    %c0_20 = arith.constant 0 : index
    %c0_21 = arith.constant 0 : index
    %26 = vector.load %arg9[%c0_20, %c0_21] : memref<1x128xf32, #tpu.memory_space<vmem>>, vector<1x128xf32>
    %cst_22 = arith.constant dense<0.000000e+00> : vector<16x128xf32>
    %27 = tpu.matmul %24, %25, %cst_22 {dimension_numbers = #tpu.dot_dimension_numbers<[1], [0], [0], [1], [0, 0, 1, 1], [], []>} : vector<16x128xbf16>, vector<128x128xbf16>, vector<16x128xf32> -> vector<16x128xf32>
    %28 = vector.broadcast %26 : vector<1x128xf32> to vector<16x128xf32>
    %29 = arith.addf %27, %28 : vector<16x128xf32>
    %c0_23 = arith.constant 0 : index
    %c0_24 = arith.constant 0 : index
    %30 = vector.load %arg10[%c0_23, %c0_24] : memref<16x128xf32, #tpu.memory_space<vmem>>, vector<16x128xf32>
    tpu.vector_store %arg10[%c0_23, %c0_24], %29 {strides = array<i32>} : memref<16x128xf32, #tpu.memory_space<vmem>>, vector<16x128xf32>,
    return
  }
  func.func @transform_0(%arg0: i32) -> (i32, i32) {
    %c0_i32 = arith.constant 0 : i32
    %c0_i32_0 = arith.constant 0 : i32
    return %arg0, %c0_i32 : i32, i32
  }
  func.func @transform_1(%arg0: i32) -> (i32, i32) {
    %c0_i32 = arith.constant 0 : i32
    %c0_i32_0 = arith.constant 0 : i32
    %c0_i32_1 = arith.constant 0 : i32
    return %c0_i32, %c0_i32_0 : i32, i32
  }
  func.func @transform_2(%arg0: i32) -> (i32, i32) {
    %c0_i32 = arith.constant 0 : i32
    %c0_i32_0 = arith.constant 0 : i32
    %c0_i32_1 = arith.constant 0 : i32
    return %c0_i32, %c0_i32_0 : i32, i32
  }
  func.func @transform_3(%arg0: i32) -> (i32, i32) {
    %c0_i32 = arith.constant 0 : i32
    %c0_i32_0 = arith.constant 0 : i32
    %c0_i32_1 = arith.constant 0 : i32
    return %c0_i32, %c0_i32_0 : i32, i32
  }
  func.func @transform_4(%arg0: i32) -> (i32, i32) {
    %c0_i32 = arith.constant 0 : i32
    %c0_i32_0 = arith.constant 0 : i32
    %c0_i32_1 = arith.constant 0 : i32
    return %c0_i32, %c0_i32_0 : i32, i32
  }
  func.func @transform_5(%arg0: i32) -> (i32, i32) {
    %c0_i32 = arith.constant 0 : i32
    %c0_i32_0 = arith.constant 0 : i32
    %c0_i32_1 = arith.constant 0 : i32
    return %c0_i32, %c0_i32_0 : i32, i32
  }
  func.func @transform_6(%arg0: i32) -> (i32, i32) {
    %c0_i32 = arith.constant 0 : i32
    %c0_i32_0 = arith.constant 0 : i32
    %c0_i32_1 = arith.constant 0 : i32
    return %c0_i32, %c0_i32_0 : i32, i32
  }
  func.func @transform_7(%arg0: i32) -> (i32, i32) {
    %c0_i32 = arith.constant 0 : i32
    %c0_i32_0 = arith.constant 0 : i32
    %c0_i32_1 = arith.constant 0 : i32
    return %c0_i32, %c0_i32_0 : i32, i32
  }
  func.func @transform_8(%arg0: i32) -> (i32, i32) {
    %c0_i32 = arith.constant 0 : i32
    %c0_i32_0 = arith.constant 0 : i32
    %c0_i32_1 = arith.constant 0 : i32
    return %c0_i32, %c0_i32_0 : i32, i32
  }
  func.func @transform_9(%arg0: i32) -> (i32, i32) {
    %c0_i32 = arith.constant 0 : i32
    %c0_i32_0 = arith.constant 0 : i32
    return %arg0, %c0_i32 : i32, i32
  }
}

</mosaic_0001>

<bundles_post_ra>
// kernel: mlp_forward.1
= control target key start
LH: loop header
LB: loop body
LE: loop exit
PB: predicated region body
PF: predicated region fallthrough
CT: control target
= control target key end

     0   :  { %14 = vsyncpa [#allocation3], 0  ;;  %s1748_s0 = inlined_call_operand.vmem [shape: bf16[16,896], index: 0, kind: input, shape index: {}]   ;;  %s1749_s1 = inlined_call_operand.vmem [shape: bf16[896,128], index: 1, kind: input, shape index: {}]   ;;  %s1750_s2 = inlined_call_operand.vmem [shape: f32[1,128], index: 2, kind: input, shape index: {}]   ;;  %s1751_s3 = inlined_call_operand.hbm [shape: bf16[128,128], index: 3, kind: input, shape index: {}]   ;;  %s1752_s4 = inlined_call_operand.vmem [shape: f32[1,128], index: 4, kind: input, shape index: {}]   ;;  %s1753_s5 = inlined_call_operand.hbm [shape: bf16[128,128], index: 5, kind: input, shape index: {}]   ;;  %s1754_s6 = inlined_call_operand.vmem [shape: f32[1,128], index: 6, kind: input, shape index: {}]   ;;  %s1755_s7 = inlined_call_operand.hbm [shape: bf16[128,128], index: 7, kind: input, shape index: {}]   ;;  %s1756_s8 = inlined_call_operand.vmem [shape: f32[1,128], index: 8, kind: input, shape index: {}]   ;;  %s1757_s9 = inlined_call_operand.vmem [shape: f32[16,128], index: 9, kind: output, shape index: {}]  }
   0x1   :  { %15 = vsyncpa [#allocation5], 0  ;;  %s41_s11 = sshll.u32 %s1753_s5, 4  ;;  %s1456_s12 = smov [#allocation4]   ;;  %s42_s11 = int_to_ptr.hbm [resolvable:$true] %s41_s11 }
   0x2   :  { %s43_s13 = sshll.u32 %s1456_s12, 4  ;;  %s26_s16 = sshll.u32 %s1751_s3, 4  ;;  %s44_s13 = int_to_ptr.vmem [resolvable:$true] %s43_s13  ;;  %s27_s16 = int_to_ptr.hbm [resolvable:$true] %s26_s16 }
   0x3   :  { %s1457_s17 = smov 64   ;;  %s1458_s18 = smov 4  }
   0x4   :  { %49 = dma.hbm_to_vmem [thread:$0]  %s42_s11, 1024, %s44_s13, [#allocation5], %s1457_s17, %s1457_s17, %s1458_s18  }
   0x5   :  { %s1459_s19 = smov [#allocation2]   ;;  %s56_s23 = sshll.u32 %s1755_s7, 4  ;;  %s57_s23 = int_to_ptr.hbm [resolvable:$true] %s56_s23 }
   0x6   :  { %s28_s20 = sshll.u32 %s1459_s19, 4  ;;  %s1460_s5 = smov [#allocation6]   ;;  %s29_s20 = int_to_ptr.vmem [resolvable:$true] %s28_s20 }
   0x7   :  { %34 = dma.hbm_to_vmem [thread:$0]  %s27_s16, 1024, %s29_s20, [#allocation3], %s1457_s17, %s1457_s17, %s1458_s18  }
   0x8   :  { %s58_s24 = sshll.u32 %s1460_s5, 4  ;;  %s59_s24 = int_to_ptr.vmem [resolvable:$true] %s58_s24 }
   0x9   :  { %64 = dma.hbm_to_vmem [thread:$0]  %s57_s23, 1024, %s59_s24, [#allocation5], %s1457_s17, %s1457_s17, %s1458_s18  }
   0xa   :  { %1452 = dma.done.wait [#allocation3], 1024  }
   0xb   :  { %1453 = vsyncadd [#allocation3], 4294966272 }
   0xc   :  { %1454 = dma.done.wait [#allocation5], 2048  }
   0xd   :  { %1455 = vsyncadd [#allocation5], 4294965248  ;;  %v1298_v0 = vld [vmem:[%s1749_s1 + $0x38] sm:$0xff]  ;;  %v1297_v3 = vld [vmem:[%s1749_s1 + $0x30] sm:$0xff] }
   0xe   :  { %v1306_v1 = vld [vmem:[%s1749_s1 + $0x78] sm:$0xff]  ;;  %575 = vmatpush.bf16.msra.mxu0 %v1298_v0  ;;  %v1305_v4 = vld [vmem:[%s1749_s1 + $0x70] sm:$0xff]  ;;  %v1296_v8 = vld [vmem:[%s1749_s1 + $0x28] sm:$0xff] }
   0xf   :  { %v1314_v2 = vld [vmem:[%s1749_s1 + $0xb8] sm:$0xff]  ;;  %589 = vmatpush.bf16.msra.mxu1 %v1306_v1  ;;  %v1313_v6 = vld [vmem:[%s1749_s1 + $0xb0] sm:$0xff]  ;;  %v1304_v9 = vld [vmem:[%s1749_s1 + $0x68] sm:$0xff] }
  0x10   :  { %v1322_v5 = vld [vmem:[%s1749_s1 + $0xf8] sm:$0xff]  ;;  %603 = vmatpush.bf16.msra.mxu2 %v1314_v2  ;;  %v1321_v7 = vld [vmem:[%s1749_s1 + $0xf0] sm:$0xff]  ;;  %v1312_v10 = vld [vmem:[%s1749_s1 + $0xa8] sm:$0xff] }
  0x11   :  { %617 = vmatpush.bf16.msra.mxu3 %v1322_v5  ;;  %v1320_v11 = vld [vmem:[%s1749_s1 + $0xe8] sm:$0xff]  ;;  %v1295_v12 = vld [vmem:[%s1749_s1 + $0x20] sm:$0xff]  ;;  %v1294_v16 = vld [vmem:[%s1749_s1 + $0x18] sm:$0xff] }
  0x12   :  { %576 = vmatpush.bf16.msra.mxu0 %v1297_v3  ;;  %v1303_v13 = vld [vmem:[%s1749_s1 + $0x60] sm:$0xff]  ;;  %v1302_v17 = vld [vmem:[%s1749_s1 + $0x58] sm:$0xff]  ;;  %v1293_v20 = vld [vmem:[%s1749_s1 + $0x10] sm:$0xff] }
  0x13   :  { %590 = vmatpush.bf16.msra.mxu1 %v1305_v4  ;;  %v1311_v14 = vld [vmem:[%s1749_s1 + $0xa0] sm:$0xff]  ;;  %v1310_v18 = vld [vmem:[%s1749_s1 + $0x98] sm:$0xff]  ;;  %v1301_v21 = vld [vmem:[%s1749_s1 + $0x50] sm:$0xff] }
  0x14   :  { %604 = vmatpush.bf16.msra.mxu2 %v1313_v6  ;;  %v1319_v15 = vld [vmem:[%s1749_s1 + $0xe0] sm:$0xff]  ;;  %v1318_v19 = vld [vmem:[%s1749_s1 + $0xd8] sm:$0xff]  ;;  %v1309_v22 = vld [vmem:[%s1749_s1 + $0x90] sm:$0xff] }
  0x15   :  { %618 = vmatpush.bf16.msra.mxu3 %v1321_v7  ;;  %v1317_v23 = vld [vmem:[%s1749_s1 + $0xd0] sm:$0xff]  ;;  %v1292_v24 = vld [vmem:[%s1749_s1 + $0x8] sm:$0xff]  ;;  %v1291_v27 = vld [vmem:[%s1749_s1] sm:$0xff] }
  0x16   :  { %577 = vmatpush.bf16.msra.mxu0 %v1296_v8  ;;  %v1300_v25 = vld [vmem:[%s1749_s1 + $0x48] sm:$0xff]  ;;  %v1299_v29 = vld [vmem:[%s1749_s1 + $0x40] sm:$0xff]  ;;  %v1330_v31 = vld [vmem:[%s1749_s1 + $0x138] sm:$0xff] }
  0x17   :  { %591 = vmatpush.bf16.msra.mxu1 %v1304_v9  ;;  %v1308_v26 = vld [vmem:[%s1749_s1 + $0x88] sm:$0xff]  ;;  %v1307_v30 = vld [vmem:[%s1749_s1 + $0x80] sm:$0xff]  ;;  %v1287_v34 = vld [vmem:[%s1748_s0 + $0x18] sm:$0xf0] }
  0x18   :  { %605 = vmatpush.bf16.msra.mxu2 %v1312_v10  ;;  %v1316_v28 = vld [vmem:[%s1749_s1 + $0xc8] sm:$0xff]  ;;  %v938_v33 = vld [vmem:[%s1748_s0] sm:$0xf]  ;;  %v1288_v35 = vld [vmem:[%s1748_s0 + $0x20] sm:$0xf0] }
  0x19   :  { %619 = vmatpush.bf16.msra.mxu3 %v1320_v11  ;;  %v946_v32 = vld [vmem:[%s1748_s0 + $0x8] sm:$0xf]  ;;  %v1284_v36 = vld [vmem:[%s1748_s0 + $0x4] sm:$0xf]  ;;  %v940_v37 = vld [vmem:[%s1748_s0 + $0x1c] sm:$0xf0]  ;;  %v939_v41 = vor.u32 %v1287_v34, %v938_v33 }
  0x1a   :  { %578 = vmatpush.bf16.msra.mxu0 %v1295_v12  ;;  %v1338_v38 = vld [vmem:[%s1749_s1 + $0x178] sm:$0xff]  ;;  %v1315_v40 = vld [vmem:[%s1749_s1 + $0xc0] sm:$0xff]  ;;  %v947_v42 = vor.u32 %v1288_v35, %v946_v32  ;;  %v1285_v43 = vld [vmem:[%s1748_s0 + $0xc] sm:$0xf]  ;;  %v943_v45 = vor.u32 %v1284_v36, %v940_v37 }
  0x1b   :  { %592 = vmatpush.bf16.msra.mxu1 %v1303_v13  ;;  %v1346_v39 = vld [vmem:[%s1749_s1 + $0x1b8] sm:$0xff]  ;;  %v948_v44 = vld [vmem:[%s1748_s0 + $0x24] sm:$0xf0]  ;;  %v1329_v46 = vld [vmem:[%s1749_s1 + $0x130] sm:$0xff] }
  0x1c   :  { %606 = vmatpush.bf16.msra.mxu2 %v1311_v14  ;;  %v1337_v47 = vld [vmem:[%s1749_s1 + $0x170] sm:$0xff]  ;;  %v951_v49 = vor.u32 %v1285_v43, %v948_v44  ;;  %v1328_v50 = vld [vmem:[%s1749_s1 + $0x128] sm:$0xff]  ;;  %v1327_v53 = vld [vmem:[%s1749_s1 + $0x120] sm:$0xff] }
  0x1d   :  { %620 = vmatpush.bf16.msra.mxu3 %v1319_v15  ;;  %v1345_v48 = vld [vmem:[%s1749_s1 + $0x1b0] sm:$0xff]  ;;  %v1336_v51 = vld [vmem:[%s1749_s1 + $0x168] sm:$0xff]  ;;  %v1335_v54 = vld [vmem:[%s1749_s1 + $0x160] sm:$0xff] }
  0x1e   :  { %579 = vmatpush.bf16.msra.mxu0 %v1294_v16  ;;  %v1344_v52 = vld [vmem:[%s1749_s1 + $0x1a8] sm:$0xff]  ;;  %v1343_v55 = vld [vmem:[%s1749_s1 + $0x1a0] sm:$0xff]  ;;  %v1326_v56 = vld [vmem:[%s1749_s1 + $0x118] sm:$0xff] }
  0x1f   :  { %593 = vmatpush.bf16.msra.mxu1 %v1302_v17  ;;  %v1334_v57 = vld [vmem:[%s1749_s1 + $0x158] sm:$0xff]  ;;  %v1325_v59 = vld [vmem:[%s1749_s1 + $0x110] sm:$0xff]  ;;  %v1324_v62 = vld [vmem:[%s1749_s1 + $0x108] sm:$0xff] }
  0x20   :  { %607 = vmatpush.bf16.msra.mxu2 %v1310_v18  ;;  %v1342_v58 = vld [vmem:[%s1749_s1 + $0x198] sm:$0xff]  ;;  %v1333_v60 = vld [vmem:[%s1749_s1 + $0x150] sm:$0xff]  ;;  %v1332_v63 = vld [vmem:[%s1749_s1 + $0x148] sm:$0xff] }
  0x21   :  { %621 = vmatpush.bf16.msra.mxu3 %v1318_v19  ;;  %v1341_v61 = vld [vmem:[%s1749_s1 + $0x190] sm:$0xff]  ;;  %v1340_v0 = vld [vmem:[%s1749_s1 + $0x188] sm:$0xff]  ;;  %v1323_v1 = vld [vmem:[%s1749_s1 + $0x100] sm:$0xff] }
  0x22   :  { %580 = vmatpush.bf16.msra.mxu0 %v1293_v20  ;;  %v1331_v2 = vld [vmem:[%s1749_s1 + $0x140] sm:$0xff]  ;;  %v954_v4 = vld [vmem:[%s1748_s0 + $0x10] sm:$0xf]  ;;  %v1289_v5 = vld [vmem:[%s1748_s0 + $0x28] sm:$0xf0] }
  0x23   :  { %594 = vmatpush.bf16.msra.mxu1 %v1301_v21  ;;  %v1339_v3 = vld [vmem:[%s1749_s1 + $0x180] sm:$0xff]  ;;  %v1286_v6 = vld [vmem:[%s1748_s0 + $0x14] sm:$0xf]  ;;  %v956_v7 = vld [vmem:[%s1748_s0 + $0x2c] sm:$0xf0]  ;;  %v955_v10 = vor.u32 %v1289_v5, %v954_v4 }
  0x24   :  { %608 = vmatpush.bf16.msra.mxu2 %v1309_v22  ;;  %v962_v8 = vld [vmem:[%s1748_s0 + $0x18] sm:$0xf]  ;;  %v1290_v9 = vld [vmem:[%s1748_s0 + $0x30] sm:$0xf0]  ;;  %v959_v11 = vor.u32 %v1286_v6, %v956_v7  ;;  %v1352_v15 = vld [vmem:[#allocation2 + $0x28] sm:$0xff] }
  0x25   :  { %622 = vmatpush.bf16.msra.mxu3 %v1317_v23  ;;  %v963_v12 = vor.u32 %v1290_v9, %v962_v8  ;;  %v1354_v13 = vld [vmem:[#allocation2 + $0x38] sm:$0xff]  ;;  %v1353_v14 = vld [vmem:[#allocation2 + $0x30] sm:$0xff]  ;;  %v1351_v16 = vld [vmem:[#allocation2 + $0x20] sm:$0xff] }
  0x26   :  { %581 = vmatpush.bf16.msra.mxu0 %v1292_v24  ;;  %v1350_v17 = vld [vmem:[#allocation2 + $0x18] sm:$0xff]  ;;  %v1349_v18 = vld [vmem:[#allocation2 + $0x10] sm:$0xff]  ;;  %v1348_v19 = vld [vmem:[#allocation2 + $0x8] sm:$0xff] }
  0x27   :  { %595 = vmatpush.bf16.msra.mxu1 %v1300_v25  ;;  %v1347_v22 = vld [vmem:[#allocation2] sm:$0xff]  ;;  %v1362_v25 = vld [vmem:[#allocation4 + $0x38] sm:$0xff]  ;;  %v1360_v32 = vld [vmem:[#allocation4 + $0x28] sm:$0xff] }
  0x28   :  { %609 = vmatpush.bf16.msra.mxu2 %v1308_v26  ;;  %v1376_v24 = vld [vmem:[%s1750_s2] ss:$0 sm:$0xff]  ;;  %v1366_v9 = vld [vmem:[#allocation6 + $0x18] sm:$0xff] }
  0x29   :  { %623 = vmatpush.bf16.msra.mxu3 %v1316_v28  ;;  %v1359_v37 = vld [vmem:[#allocation4 + $0x20] sm:$0xff] }
  0x2a   :  { %582 = vmatpush.bf16.msra.mxu0 %v1291_v27  ;;  %v1361_v27 = vld [vmem:[#allocation4 + $0x30] sm:$0xff] }
  0x2b   :  { %596 = vmatpush.bf16.msra.mxu1 %v1299_v29 }
  0x2c   :  { %610 = vmatpush.bf16.msra.mxu2 %v1307_v30 }
  0x2d   :  { %624 = vmatpush.bf16.msra.mxu3 %v1315_v40  ;;  %583 = vmatmul.bf16.vlgmr.msra.gmra.mxu0 %v939_v41 }
  0x2e   :  { %631 = vmatpush.bf16.msrb.mxu0 %v1330_v31  ;;  %597 = vmatmul.bf16.vlgmr.msra.gmra.mxu1 %v943_v45 }
  0x2f   :  { %645 = vmatpush.bf16.msrb.mxu1 %v1338_v38  ;;  %611 = vmatmul.bf16.vlgmr.msra.gmra.mxu2 %v947_v42 }
  0x30   :  { %659 = vmatpush.bf16.msrb.mxu2 %v1346_v39  ;;  %625 = vmatmul.bf16.vlgmr.msra.gmra.mxu3 %v951_v49 }
  0x31   :  { %744 = vmatpush.bf16.msrb.mxu3 %v1354_v13 }
  0x32   :  { %632 = vmatpush.bf16.msrb.mxu0 %v1329_v46 }
  0x33   :  { %646 = vmatpush.bf16.msrb.mxu1 %v1337_v47 }
  0x34   :  { %660 = vmatpush.bf16.msrb.mxu2 %v1345_v48 }
  0x35   :  { %745 = vmatpush.bf16.msrb.mxu3 %v1353_v14  ;;  %v1378_v14 = vld [vmem:[%s1754_s6] ss:$0 sm:$0xff] }
  0x36   :  { %633 = vmatpush.bf16.msrb.mxu0 %v1328_v50 }
  0x37   :  { %647 = vmatpush.bf16.msrb.mxu1 %v1336_v51 }
  0x38   :  { %661 = vmatpush.bf16.msrb.mxu2 %v1344_v52 }
  0x39   :  { %746 = vmatpush.bf16.msrb.mxu3 %v1352_v15 }
  0x3a   :  { %634 = vmatpush.bf16.msrb.mxu0 %v1327_v53 }
  0x3b   :  { %648 = vmatpush.bf16.msrb.mxu1 %v1335_v54 }
  0x3c   :  { %662 = vmatpush.bf16.msrb.mxu2 %v1343_v55 }
  0x3d   :  { %747 = vmatpush.bf16.msrb.mxu3 %v1351_v16 }
  0x3e   :  { %635 = vmatpush.bf16.msrb.mxu0 %v1326_v56 }
  0x3f   :  { %649 = vmatpush.bf16.msrb.mxu1 %v1334_v57  ;;  %v1358_v57 = vld [vmem:[#allocation4 + $0x18] sm:$0xff] }
  0x40   :  { %663 = vmatpush.bf16.msrb.mxu2 %v1342_v58  ;;  %v1357_v58 = vld [vmem:[#allocation4 + $0x10] sm:$0xff] }
  0x41   :  { %748 = vmatpush.bf16.msrb.mxu3 %v1350_v17 }
  0x42   :  { %636 = vmatpush.bf16.msrb.mxu0 %v1325_v59  ;;  %v1356_v59 = vld [vmem:[#allocation4 + $0x8] sm:$0xff] }
  0x43   :  { %650 = vmatpush.bf16.msrb.mxu1 %v1333_v60  ;;  %v1355_v60 = vld [vmem:[#allocation4] sm:$0xff] }
  0x44   :  { %664 = vmatpush.bf16.msrb.mxu2 %v1341_v61  ;;  %v1370_v61 = vld [vmem:[#allocation6 + $0x38] sm:$0xff] }
  0x45   :  { %749 = vmatpush.bf16.msrb.mxu3 %v1349_v18 }
  0x46   :  { %637 = vmatpush.bf16.msrb.mxu0 %v1324_v62  ;;  %v1369_v62 = vld [vmem:[#allocation6 + $0x30] sm:$0xff] }
  0x47   :  { %651 = vmatpush.bf16.msrb.mxu1 %v1332_v63  ;;  %v1368_v63 = vld [vmem:[#allocation6 + $0x28] sm:$0xff] }
  0x48   :  { %665 = vmatpush.bf16.msrb.mxu2 %v1340_v0  ;;  %v1367_v0 = vld [vmem:[#allocation6 + $0x20] sm:$0xff] }
  0x49   :  { %750 = vmatpush.bf16.msrb.mxu3 %v1348_v19 }
  0x4a   :  { %638 = vmatpush.bf16.msrb.mxu0 %v1323_v1 }
  0x4b   :  { %652 = vmatpush.bf16.msrb.mxu1 %v1331_v2  ;;  %v1377_v2 = vld [vmem:[%s1752_s4] ss:$0 sm:$0xff] }
  0x4c   :  { %666 = vmatpush.bf16.msrb.mxu2 %v1339_v3 }
  0x4d   :  { %639 = vmatmul.bf16.vlgmr.msrb.gmra.mxu0 %v955_v10  ;;  %751 = vmatpush.bf16.msrb.mxu3 %v1347_v22  ;;  %v1365_v10 = vld [vmem:[#allocation6 + $0x10] sm:$0xff] }
  0x4e   :  { %653 = vmatmul.bf16.vlgmr.msrb.gmra.mxu1 %v959_v11  ;;  %829 = vmatpush.bf16.msra.mxu0 %v1362_v25  ;;  %v1364_v11 = vld [vmem:[#allocation6 + $0x8] sm:$0xff] }
  0x4f   :  { %667 = vmatmul.bf16.vlgmr.msrb.gmra.mxu2 %v963_v12  ;;  %914 = vmatpush.bf16.msra.mxu1 %v1370_v61  ;;  %v1363_v12 = vld [vmem:[#allocation6] sm:$0xff] }
  0x52   :  { %830 = vmatpush.bf16.msra.mxu0 %v1361_v27 }
  0x53   :  { %915 = vmatpush.bf16.msra.mxu1 %v1369_v62 }
  0x56   :  { %831 = vmatpush.bf16.msra.mxu0 %v1360_v32 }
  0x57   :  { %916 = vmatpush.bf16.msra.mxu1 %v1368_v63 }
  0x5a   :  { %832 = vmatpush.bf16.msra.mxu0 %v1359_v37 }
  0x5b   :  { %917 = vmatpush.bf16.msra.mxu1 %v1367_v0 }
  0x5e   :  { %833 = vmatpush.bf16.msra.mxu0 %v1358_v57 }
  0x5f   :  { %918 = vmatpush.bf16.msra.mxu1 %v1366_v9 }
  0x62   :  { %834 = vmatpush.bf16.msra.mxu0 %v1357_v58 }
  0x63   :  { %919 = vmatpush.bf16.msra.mxu1 %v1365_v10 }
  0x66   :  { %835 = vmatpush.bf16.msra.mxu0 %v1356_v59 }
  0x67   :  { %920 = vmatpush.bf16.msra.mxu1 %v1364_v11 }
  0x6a   :  { %836 = vmatpush.bf16.msra.mxu0 %v1355_v60 }
  0x6b   :  { %921 = vmatpush.bf16.msra.mxu1 %v1363_v12 }
  0xaa   :  { %v584_v20 = vpop.f32.mrf.mxu0 }
  0xab   :  { %v598_v21 = vpop.f32.mrf.mxu1  ;;  %v585_v28 = vadd.f32 %v1376_v24, %v584_v20 }
  0xad   :  { %v599_v33 = vadd.f32 %v598_v21, %v585_v28  ;;  %v1379_v21 = vld [vmem:[%s1756_s8] ss:$0 sm:$0xff] }
  0xb2   :  { %v612_v23 = vpop.f32.mrf.mxu2  ;;  %v586_v26 = vpop.f32.mrf.mxu0 }
  0xb3   :  { %v626_v29 = vpop.f32.mrf.mxu3  ;;  %v600_v30 = vpop.f32.mrf.mxu1  ;;  %v587_v31 = vadd.f32 %v1376_v24, %v586_v26  ;;  %v613_v38 = vadd.f32 %v612_v23, %v599_v33 }
  0xb5   :  { %v601_v35 = vadd.f32 %v600_v30, %v587_v31  ;;  %v627_v42 = vadd.f32 %v626_v29, %v613_v38 }
  0xba   :  { %v614_v34 = vpop.f32.mrf.mxu2 }
  0xbb   :  { %v615_v40 = vadd.f32 %v614_v34, %v601_v35  ;;  %v628_v41 = vpop.f32.mrf.mxu3 }
  0xbd   :  { %v629_v44 = vadd.f32 %v628_v41, %v615_v40 }
  0xca   :  { %v640_v36 = vpop.f32.mrf.mxu0 }
  0xcb   :  { %v654_v39 = vpop.f32.mrf.mxu1  ;;  %v641_v45 = vadd.f32 %v640_v36, %v627_v42 }
  0xcd   :  { %v655_v48 = vadd.f32 %v654_v39, %v641_v45 }
  0xd2   :  { %v668_v43 = vpop.f32.mrf.mxu2  ;;  %v642_v46 = vpop.f32.mrf.mxu0 }
  0xd3   :  { %v643_v47 = vadd.f32 %v642_v46, %v629_v44  ;;  %v656_v49 = vpop.f32.mrf.mxu1  ;;  %v669_v50 = vadd.f32 %v668_v43, %v655_v48 }
  0xd5   :  { %v657_v51 = vadd.f32 %v656_v49, %v643_v47  ;;  %v673_v54 = vmax.f32 %v669_v50, 0.0 }
  0xda   :  { %v670_v52 = vpop.f32.mrf.mxu2 }
  0xdb   :  { %v671_v53 = vadd.f32 %v670_v52, %v657_v51 }
  0xdd   :  { %v674_v55 = vmax.f32 %v671_v53, 0.0 }
  0xdf   :  { %v675_v56 = vpack.c.bf16 %v674_v55, %v673_v54 }
  0xe1   :  { %752 = vmatmul.bf16.vlgmr.msrb.gmra.mxu3 %v675_v56 }
 0x164   :  { %v753_v1 = vpop.f32.mrf.mxu3 }
 0x165   :  { %v754_v3 = vadd.f32 %v1377_v2, %v753_v1 }
 0x167   :  { %v758_v6 = vmax.f32 %v754_v3, 0.0 }
 0x16c   :  { %v755_v4 = vpop.f32.mrf.mxu3 }
 0x16d   :  { %v756_v5 = vadd.f32 %v1377_v2, %v755_v4 }
 0x16f   :  { %v759_v7 = vmax.f32 %v756_v5, 0.0 }
 0x171   :  { %v760_v8 = vpack.c.bf16 %v759_v7, %v758_v6 }
 0x173   :  { %837 = vmatmul.bf16.vlgmr.msra.gmra.mxu0 %v760_v8 }
 0x1f0   :  { %v838_v13 = vpop.f32.mrf.mxu0 }
 0x1f1   :  { %v839_v15 = vadd.f32 %v1378_v14, %v838_v13 }
 0x1f3   :  { %v843_v18 = vmax.f32 %v839_v15, 0.0 }
 0x1f8   :  { %v840_v16 = vpop.f32.mrf.mxu0 }
 0x1f9   :  { %v841_v17 = vadd.f32 %v1378_v14, %v840_v16 }
 0x1fb   :  { %v844_v19 = vmax.f32 %v841_v17, 0.0 }
 0x1fd   :  { %v845_v20 = vpack.c.bf16 %v844_v19, %v843_v18 }
 0x1ff   :  { %922 = vmatmul.bf16.vlgmr.msra.gmra.mxu1 %v845_v20 }
 0x27c   :  { %v923_v22 = vpop.f32.mrf.mxu1 }
 0x27d   :  { %v924_v23 = vadd.f32 %v1379_v21, %v923_v22 }
 0x27f   :  { %928 = vst [vmem:[%s1757_s9] sm:$0xff] %v924_v23 }
 0x284   :  { %v925_v24 = vpop.f32.mrf.mxu1 }
 0x285   :  { %v926_v25 = vadd.f32 %v1379_v21, %v925_v24 }
 0x287   :  { %929 = vst [vmem:[%s1757_s9 + $0x8] sm:$0xff] %v926_v25 }
 0x288   :  { %934 = vsyncpa [#allocation3], 1 }
 0x289   :  { %935 = vsyncpa [#allocation5], 1 }

</bundles_post_ra>
